<compile_context>
chip_gen: v7x
topology: tpu7x:2x2x1
jax: 0.10.0
libtpu: 0.0.40
codegen_flags: <defaults>
</compile_context>

<pallas_src>
import functools

import numpy as np
import jax
import jax.numpy as jnp
from jax import lax
from jax.experimental import pallas as pl
from jax.experimental.pallas import tpu as pltpu


_LANE = 128
_SUBLANE = 8
_P_TILE = 512          # pair-axis tile (lanes); VMEM-safe on v5e/v6e/v7x
_R_TILE = 512          # relation-axis tile (sublanes, reduction axis)


def _round_up(x, m):
    return ((x + m - 1) // m) * m


# ---------------- step-1 kernel: per-relation max / argmax -------------------
def _rel_cls_kernel(rel_prob_ref, cls_ref, cls_prob_ref):
    r_tile, C = rel_prob_ref.shape
    prob = rel_prob_ref[...]                                    # [r_tile, C]
    col = lax.broadcasted_iota(jnp.int32, (r_tile, C), 1)
    prob = jnp.where(col == 0, jnp.float32(0.0), prob)          # kill background
    max_p = jnp.max(prob, axis=1, keepdims=True)                # [r_tile, 1]
    is_max = prob == max_p
    # first maximal index (matches the numpy reference; torch.max's choice
    # among ties is unspecified anyway)
    cls_ref[...] = jnp.min(jnp.where(is_max, col, jnp.int32(C)),
                           axis=1, keepdims=True)
    cls_prob_ref[...] = max_p


# ---------------- step-2/3 kernel: pair match + gather + score ---------------
def _relation_match_kernel(conn_s_ref, conn_o_ref, cls_ref, clsp_ref,
                           q_s_ref, q_o_ref, sub_sc_ref, obj_sc_ref,
                           out_ref):
    r = pl.program_id(1)

    @pl.when(r == 0)
    def _init():
        out_ref[...] = jnp.zeros_like(out_ref)

    # [R_tile, 1] vs [1, P_tile] -> [R_tile, P_tile] match matrix
    match = jnp.logical_and(conn_s_ref[...] == q_s_ref[...],
                            conn_o_ref[...] == q_o_ref[...])

    cls_f = cls_ref[...].astype(jnp.float32)                    # [R_tile, 1]
    cls_p = clsp_ref[...]                                       # [R_tile, 1]

    # At most one relation row matches a given proposal pair (connect_arr is a
    # full permutation without diagonal), so masked sums == per-pair gather;
    # unmatched pairs keep the 0 init (the `continue` branch in PyTorch).
    # TODO(synk): if connect_arrs ever contained duplicate (sub,obj) rows this
    # would sum matches instead of taking the first one like PyTorch.
    label_add = jnp.sum(jnp.where(match, cls_f, 0.0), axis=0, keepdims=True)
    prob_add = jnp.sum(jnp.where(match, cls_p, 0.0), axis=0, keepdims=True)

    out_ref[0:1, :] = out_ref[0:1, :] + label_add               # label (as f32)
    out_ref[1:2, :] = out_ref[1:2, :] + prob_add                # phrase prob

    @pl.when(r == pl.num_programs(1) - 1)
    def _finalize():
        out_ref[2:3, :] = out_ref[1:2, :] * sub_sc_ref[...] * obj_sc_ref[...]


# -------------------------- padded / jitted core ------------------------------
@functools.partial(jax.jit, static_argnames=("p_tile", "r_tile"))
def _relation_match_padded(rel_prob, conn_sub, conn_obj, q_sub, q_obj,
                           sub_sc, obj_sc, *, p_tile, r_tile):
    R_pad, C = rel_prob.shape
    P_pad = q_sub.shape[1]

    # step 1: hoisted per-relation max/argmax (computed once, not per P tile)
    rel_cls, rel_cls_prob = pl.pallas_call(
        _rel_cls_kernel,
        out_shape=(jax.ShapeDtypeStruct((R_pad, 1), jnp.int32),
                   jax.ShapeDtypeStruct((R_pad, 1), jnp.float32)),
        grid=(R_pad // r_tile,),
        in_specs=[pl.BlockSpec((r_tile, C), lambda i: (i, 0))],
        out_specs=(pl.BlockSpec((r_tile, 1), lambda i: (i, 0)),
                   pl.BlockSpec((r_tile, 1), lambda i: (i, 0))),
        compiler_params=pltpu.CompilerParams(
            dimension_semantics=("parallel",)),
    )(rel_prob)

    # step 2/3: tiled match kernel, P parallel, R reduction (output resident)
    packed = pl.pallas_call(
        _relation_match_kernel,
        out_shape=jax.ShapeDtypeStruct((8, P_pad), jnp.float32),
        grid=(P_pad // p_tile, R_pad // r_tile),
        in_specs=[
            pl.BlockSpec((r_tile, 1), lambda p, r: (r, 0)),     # conn_sub
            pl.BlockSpec((r_tile, 1), lambda p, r: (r, 0)),     # conn_obj
            pl.BlockSpec((r_tile, 1), lambda p, r: (r, 0)),     # rel_cls
            pl.BlockSpec((r_tile, 1), lambda p, r: (r, 0)),     # rel_cls_prob
            pl.BlockSpec((1, p_tile), lambda p, r: (0, p)),     # q_sub
            pl.BlockSpec((1, p_tile), lambda p, r: (0, p)),     # q_obj
            pl.BlockSpec((1, p_tile), lambda p, r: (0, p)),     # sub_scores
            pl.BlockSpec((1, p_tile), lambda p, r: (0, p)),     # obj_scores
        ],
        out_specs=pl.BlockSpec((8, p_tile), lambda p, r: (0, p)),
        compiler_params=pltpu.CompilerParams(
            dimension_semantics=("parallel", "arbitrary"),
            vmem_limit_bytes=32 * 1024 * 1024),
    )(conn_sub, conn_obj, rel_cls, rel_cls_prob, q_sub, q_obj, sub_sc, obj_sc)
    return packed


def relation_match(rel_prob, conn_pairs, query_pairs, sub_scores, obj_scores,
                   *, p_tile_max=_P_TILE, r_tile_max=_R_TILE):
    """
    rel_prob:    [R, C] f32  relation class probabilities
    conn_pairs:  [R, 2] i32  (sub_prop_idx, obj_prop_idx) of each relation prop
    query_pairs: [P, 2] i32  detection pairs mapped to proposal indices (>= 0)
    sub_scores:  [P]    f32
    obj_scores:  [P]    f32
    returns (phrase_pred_label [P] i32, phrase_pred_prob [P] f32,
             overall_score [P] f32)
    Note: PyTorch uses int64 labels; int32 used here (TPU native).
    """
    rel_prob = np.asarray(rel_prob, np.float32)
    conn_pairs = np.asarray(conn_pairs, np.int32)
    query_pairs = np.asarray(query_pairs, np.int32)
    sub_scores = np.asarray(sub_scores, np.float32)
    obj_scores = np.asarray(obj_scores, np.float32)

    R, C = rel_prob.shape
    P = query_pairs.shape[0]
    if P == 0 or R == 0:   # host-side guard for degenerate images
        return (jnp.zeros((P,), jnp.int32), jnp.zeros((P,), jnp.float32),
                jnp.zeros((P,), jnp.float32))

    # shape bucketing: pad R to sublane-aligned, P to lane-aligned tile sizes
    if R <= r_tile_max:
        R_pad = _round_up(R, _SUBLANE)
        r_tile = R_pad
    else:
        R_pad = _round_up(R, r_tile_max)
        r_tile = r_tile_max
    if P <= p_tile_max:
        P_pad = _round_up(P, _LANE)
        p_tile = P_pad
    else:
        P_pad = _round_up(P, p_tile_max)
        p_tile = p_tile_max

    rel_prob_p = np.zeros((R_pad, C), np.float32)
    rel_prob_p[:R] = rel_prob
    conn_sub = np.full((R_pad, 1), -2, np.int32)    # sentinel: never matches
    conn_obj = np.full((R_pad, 1), -2, np.int32)
    conn_sub[:R, 0] = conn_pairs[:, 0]
    conn_obj[:R, 0] = conn_pairs[:, 1]
    q_sub = np.full((1, P_pad), -1, np.int32)       # sentinel: never matches
    q_obj = np.full((1, P_pad), -1, np.int32)
    q_sub[0, :P] = query_pairs[:, 0]
    q_obj[0, :P] = query_pairs[:, 1]
    sub_sc = np.zeros((1, P_pad), np.float32)
    obj_sc = np.zeros((1, P_pad), np.float32)
    sub_sc[0, :P] = sub_scores
    obj_sc[0, :P] = obj_scores

    packed = _relation_match_padded(
        jnp.asarray(rel_prob_p), jnp.asarray(conn_sub), jnp.asarray(conn_obj),
        jnp.asarray(q_sub), jnp.asarray(q_obj),
        jnp.asarray(sub_sc), jnp.asarray(obj_sc),
        p_tile=p_tile, r_tile=r_tile)

    label = packed[0, :P].astype(jnp.int32)   # class ids are small -> exact
    ph_prob = packed[1, :P]
    overall = packed[2, :P]
    return label, ph_prob, overall


# ------------------------------ host-side glue --------------------------------
def make_pair(n):
    """All ordered pairs (i, j), i != j, of n instances. Shape (2, n*(n-1))."""
    ii, jj = np.meshgrid(np.arange(n), np.arange(n), indexing="ij")
    ii = ii.reshape(-1)
    jj = jj.reshape(-1)
    keep = ii != jj
    return np.stack([ii[keep], jj[keep]], axis=0)


class RelationResultPostProcess:
    """JAX/Pallas re-implementation of the PyTorch module's forward."""

    def __init__(self, topk):
        self.topk = topk

    def __call__(self, rel_det_prob, inst_det_results, init_inst_props,
                 connect_arrs):
        start_idx = 0
        results = []
        for det, _prop, conn in zip(inst_det_results, init_inst_props,
                                    connect_arrs):
            rel_len = conn.shape[1]
            conn_t = np.asarray(conn).T.astype(np.int32)            # [R, 2]
            rel_prob_img = rel_det_prob[start_idx:start_idx + rel_len]
            start_idx += rel_len

            prop_idx = np.asarray(det["prop_idx"]).reshape(-1)
            scores = np.asarray(det["scores"], np.float32)
            n_det = len(prop_idx)

            det_pairs = make_pair(n_det)                            # (2, M)
            query = np.stack([prop_idx[det_pairs[0]],
                              prop_idx[det_pairs[1]]], axis=0)      # (2, M)
            non_dup = query[0] != query[1]
            det_pairs = det_pairs[:, non_dup]
            query = query[:, non_dup].astype(np.int32)              # (2, P)
            P = det_pairs.shape[1]

            if P == 0:   # no valid pairs for this image
                results.append({
                    "instance_pairs": jnp.zeros((0, 2), jnp.int32),
                    "phrase_pred_label": jnp.zeros((0,), jnp.int32),
                    "phrase_pred_prob": jnp.zeros((0,), jnp.float32),
                })
                continue

            sub_sc = scores[det_pairs[0]]
            obj_sc = scores[det_pairs[1]]

            label, ph_prob, overall = relation_match(
                rel_prob_img, conn_t, query.T, sub_sc, obj_sc)

            # topk if more pairs than topk, else full descending sort
            # TODO(synk): top-k selection done with jax.lax.top_k outside the kernel.
            k = min(self.topk, P)
            _, topk_idx = jax.lax.top_k(overall, k)

            sel_pairs = jnp.asarray(det_pairs.T)[topk_idx]          # [k, 2]
            results.append({
                "instance_pairs": sel_pairs,
                "phrase_pred_label": label[topk_idx],
                "phrase_pred_prob": ph_prob[topk_idx],
                # kept for validation of the kernel outputs
                "_kernel_inputs": (np.asarray(rel_prob_img), conn_t, query.T,
                                   np.asarray(sub_sc), np.asarray(obj_sc)),
                "_kernel_outputs": (label, ph_prob, overall),
            })
        return results


def numpy_ref_match(rel_prob, conn, query, sub_sc, obj_sc):
    """Numpy reference mirroring the original PyTorch inner loop."""
    rel_prob = rel_prob.astype(np.float32).copy()
    rel_prob[:, 0] = 0.0
    rel_cls = rel_prob.argmax(axis=1).astype(np.int32)
    rel_cls_prob = rel_prob.max(axis=1)
    P = query.shape[0]
    label = np.zeros(P, np.int32)
    prob = np.zeros(P, np.float32)
    for p in range(P):
        m = np.nonzero((conn == query[p]).sum(axis=1) >= 2)[0]
        if len(m) == 0:
            continue
        label[p] = rel_cls[m[0]]
        prob[p] = rel_cls_prob[m[0]]
    overall = prob * sub_sc * obj_sc
    return label, prob, overall


# ---------------------------------- demo --------------------------------------
if __name__ == "__main__":
    key = jax.random.PRNGKey(0)
    num_rel_classes = 16      # class 0 == background
    topk = 10
    n_props = [6, 5]          # proposals per image  -> rel_len = n*(n-1)
    # detection->proposal mapping (duplicate in image 0 exercises the
    # non_dup filtering path)
    prop_idx_per_img = [np.array([0, 2, 2, 5], np.int32),
                        np.array([1, 3, 4], np.int32)]

    rel_lens = [n * (n - 1) for n in n_props]
    total_rel = sum(rel_lens)

    key, k_prob = jax.random.split(key)
    rel_det_prob = jax.nn.softmax(
        jax.random.normal(k_prob, (total_rel, num_rel_classes),
                          dtype=jnp.float32), axis=-1)

    connect_arrs = [make_pair(n) for n in n_props]   # proposal-pair permutation
    inst_det_results = []
    init_inst_props = []
    for i, pidx in enumerate(prop_idx_per_img):
        key, k_sc = jax.random.split(key)
        scores = jax.random.uniform(k_sc, (len(pidx),), dtype=jnp.float32,
                                    minval=0.3, maxval=1.0)
        inst_det_results.append({"prop_idx": pidx, "scores": scores})
        init_inst_props.append({"num_props": n_props[i]})

    post = RelationResultPostProcess(topk)
    results = post(rel_det_prob, inst_det_results, init_inst_props,
                   connect_arrs)

    # block on everything and validate the Pallas kernels against numpy ref
    for r in results:
        if "_kernel_outputs" not in r:
            continue
        label, ph_prob, overall = (jax.block_until_ready(x)
                                   for x in r["_kernel_outputs"])
        jax.block_until_ready(r["instance_pairs"])
        jax.block_until_ready(r["phrase_pred_label"])
        jax.block_until_ready(r["phrase_pred_prob"])
        ref_label, ref_prob, ref_overall = numpy_ref_match(*r["_kernel_inputs"])
        assert np.array_equal(np.asarray(label), ref_label)
        assert np.allclose(np.asarray(ph_prob), ref_prob, rtol=1e-5, atol=1e-6)
        assert np.allclose(np.asarray(overall), ref_overall,
                           rtol=1e-5, atol=1e-6)

    print("KERNEL_OK")
</pallas_src>

<mosaic_0001>
module attributes {stable_mosaic.version = 11 : i64} {
  func.func @_relation_match_kernel(%arg0: i32, %arg1: i32, %arg2: memref<32x1xi32, #tpu.memory_space<vmem>>, %arg3: memref<32x1xi32, #tpu.memory_space<vmem>>, %arg4: memref<32x1xi32, #tpu.memory_space<vmem>>, %arg5: memref<32x1xf32, #tpu.memory_space<vmem>>, %arg6: memref<1x128xi32, #tpu.memory_space<vmem>>, %arg7: memref<1x128xi32, #tpu.memory_space<vmem>>, %arg8: memref<1x128xf32, #tpu.memory_space<vmem>>, %arg9: memref<1x128xf32, #tpu.memory_space<vmem>>, %arg10: memref<8x128xf32, #tpu.memory_space<vmem>>) attributes {dimension_semantics = [#tpu.dimension_semantics<parallel>, #tpu.dimension_semantics<arbitrary>], iteration_bounds = array<i64: 1, 1>, scalar_prefetch = 0 : i64, scratch_operands = 0 : i64, tpu.core_type = #tpu.core_type<tc>, window_params = [{transform_indices = @transform_0, window_bounds = array<i64: 32, 1>}, {transform_indices = @transform_1, window_bounds = array<i64: 32, 1>}, {transform_indices = @transform_2, window_bounds = array<i64: 32, 1>}, {transform_indices = @transform_3, window_bounds = array<i64: 32, 1>}, {transform_indices = @transform_4, window_bounds = array<i64: 1, 128>}, {transform_indices = @transform_5, window_bounds = array<i64: 1, 128>}, {transform_indices = @transform_6, window_bounds = array<i64: 1, 128>}, {transform_indices = @transform_7, window_bounds = array<i64: 1, 128>}, {transform_indices = @transform_8, window_bounds = array<i64: 8, 128>}]} {
    %c0_i32 = arith.constant 0 : i32
    %0 = arith.cmpi eq, %arg1, %c0_i32 : i32
    %1 = arith.extui %0 : i1 to i32
    %c0_i32_0 = arith.constant 0 : i32
    %2 = arith.cmpi ne, %1, %c0_i32_0 : i32
    scf.if %2 {
      %cst_24 = arith.constant 0.000000e+00 : f32
      %38 = vector.broadcast %cst_24 : f32 to vector<8x128xf32>
      %c0_25 = arith.constant 0 : index
      %c0_26 = arith.constant 0 : index
      %39 = vector.load %arg10[%c0_25, %c0_26] : memref<8x128xf32, #tpu.memory_space<vmem>>, vector<8x128xf32>
      tpu.vector_store %arg10[%c0_25, %c0_26], %38 {strides = array<i32>} : memref<8x128xf32, #tpu.memory_space<vmem>>, vector<8x128xf32>,
    } else {
    }
    %c0 = arith.constant 0 : index
    %c0_1 = arith.constant 0 : index
    %3 = vector.load %arg2[%c0, %c0_1] : memref<32x1xi32, #tpu.memory_space<vmem>>, vector<32x1xi32>
    %c0_2 = arith.constant 0 : index
    %c0_3 = arith.constant 0 : index
    %4 = vector.load %arg6[%c0_2, %c0_3] : memref<1x128xi32, #tpu.memory_space<vmem>>, vector<1x128xi32>
    %5 = vector.broadcast %3 : vector<32x1xi32> to vector<32x128xi32>
    %6 = vector.broadcast %4 : vector<1x128xi32> to vector<32x128xi32>
    %7 = arith.cmpi eq, %5, %6 : vector<32x128xi32>
    %c0_4 = arith.constant 0 : index
    %c0_5 = arith.constant 0 : index
    %8 = vector.load %arg3[%c0_4, %c0_5] : memref<32x1xi32, #tpu.memory_space<vmem>>, vector<32x1xi32>
    %c0_6 = arith.constant 0 : index
    %c0_7 = arith.constant 0 : index
    %9 = vector.load %arg7[%c0_6, %c0_7] : memref<1x128xi32, #tpu.memory_space<vmem>>, vector<1x128xi32>
    %10 = vector.broadcast %8 : vector<32x1xi32> to vector<32x128xi32>
    %11 = vector.broadcast %9 : vector<1x128xi32> to vector<32x128xi32>
    %12 = arith.cmpi eq, %10, %11 : vector<32x128xi32>
    %13 = arith.andi %7, %12 : vector<32x128xi1>
    %c0_8 = arith.constant 0 : index
    %c0_9 = arith.constant 0 : index
    %14 = vector.load %arg4[%c0_8, %c0_9] : memref<32x1xi32, #tpu.memory_space<vmem>>, vector<32x1xi32>
    %15 = arith.sitofp %14 : vector<32x1xi32> to vector<32x1xf32>
    %c0_10 = arith.constant 0 : index
    %c0_11 = arith.constant 0 : index
    %16 = vector.load %arg5[%c0_10, %c0_11] : memref<32x1xf32, #tpu.memory_space<vmem>>, vector<32x1xf32>
    %cst = arith.constant 0.000000e+00 : f32
    %17 = vector.shape_cast %15 : vector<32x1xf32> to vector<32x1xf32>
    %18 = vector.broadcast %17 : vector<32x1xf32> to vector<32x128xf32>
    %19 = vector.broadcast %cst : f32 to vector<32x128xf32>
    %20 = arith.select %13, %18, %19 : vector<32x128xi1>, vector<32x128xf32>
    %cst_12 = arith.constant dense<0.000000e+00> : vector<128xf32>
    %21 = vector.multi_reduction <add>, %20, %cst_12 [0] : vector<32x128xf32> to vector<128xf32>
    %22 = vector.shape_cast %21 : vector<128xf32> to vector<1x128xf32>
    %cst_13 = arith.constant 0.000000e+00 : f32
    %23 = vector.shape_cast %16 : vector<32x1xf32> to vector<32x1xf32>
    %24 = vector.broadcast %23 : vector<32x1xf32> to vector<32x128xf32>
    %25 = vector.broadcast %cst_13 : f32 to vector<32x128xf32>
    %26 = arith.select %13, %24, %25 : vector<32x128xi1>, vector<32x128xf32>
    %cst_14 = arith.constant dense<0.000000e+00> : vector<128xf32>
    %27 = vector.multi_reduction <add>, %26, %cst_14 [0] : vector<32x128xf32> to vector<128xf32>
    %28 = vector.shape_cast %27 : vector<128xf32> to vector<1x128xf32>
    %c0_15 = arith.constant 0 : index
    %c0_16 = arith.constant 0 : index
    %29 = vector.load %arg10[%c0_15, %c0_16] : memref<8x128xf32, #tpu.memory_space<vmem>>, vector<1x128xf32>
    %30 = arith.addf %29, %22 : vector<1x128xf32>
    %c0_17 = arith.constant 0 : index
    %c0_18 = arith.constant 0 : index
    %31 = vector.load %arg10[%c0_17, %c0_18] : memref<8x128xf32, #tpu.memory_space<vmem>>, vector<1x128xf32>
    tpu.vector_store %arg10[%c0_17, %c0_18], %30 {strides = array<i32>} : memref<8x128xf32, #tpu.memory_space<vmem>>, vector<1x128xf32>,
    %c1 = arith.constant 1 : index
    %c0_19 = arith.constant 0 : index
    %32 = vector.load %arg10[%c1, %c0_19] : memref<8x128xf32, #tpu.memory_space<vmem>>, vector<1x128xf32>
    %33 = arith.addf %32, %28 : vector<1x128xf32>
    %c1_20 = arith.constant 1 : index
    %c0_21 = arith.constant 0 : index
    %34 = vector.load %arg10[%c1_20, %c0_21] : memref<8x128xf32, #tpu.memory_space<vmem>>, vector<1x128xf32>
    tpu.vector_store %arg10[%c1_20, %c0_21], %33 {strides = array<i32>} : memref<8x128xf32, #tpu.memory_space<vmem>>, vector<1x128xf32>,
    %c0_i32_22 = arith.constant 0 : i32
    %35 = arith.cmpi eq, %arg1, %c0_i32_22 : i32
    %36 = arith.extui %35 : i1 to i32
    %c0_i32_23 = arith.constant 0 : i32
    %37 = arith.cmpi ne, %36, %c0_i32_23 : i32
    scf.if %37 {
      %c1_24 = arith.constant 1 : index
      %c0_25 = arith.constant 0 : index
      %38 = vector.load %arg10[%c1_24, %c0_25] : memref<8x128xf32, #tpu.memory_space<vmem>>, vector<1x128xf32>
      %c0_26 = arith.constant 0 : index
      %c0_27 = arith.constant 0 : index
      %39 = vector.load %arg8[%c0_26, %c0_27] : memref<1x128xf32, #tpu.memory_space<vmem>>, vector<1x128xf32>
      %40 = arith.mulf %38, %39 : vector<1x128xf32>
      %c0_28 = arith.constant 0 : index
      %c0_29 = arith.constant 0 : index
      %41 = vector.load %arg9[%c0_28, %c0_29] : memref<1x128xf32, #tpu.memory_space<vmem>>, vector<1x128xf32>
      %42 = arith.mulf %40, %41 : vector<1x128xf32>
      %c2 = arith.constant 2 : index
      %c0_30 = arith.constant 0 : index
      %43 = vector.load %arg10[%c2, %c0_30] : memref<8x128xf32, #tpu.memory_space<vmem>>, vector<1x128xf32>
      tpu.vector_store %arg10[%c2, %c0_30], %42 {strides = array<i32>} : memref<8x128xf32, #tpu.memory_space<vmem>>, vector<1x128xf32>,
    } else {
    }
    return
  }
  func.func @transform_0(%arg0: i32, %arg1: i32) -> (i32, i32) {
    %c0_i32 = arith.constant 0 : i32
    %c0_i32_0 = arith.constant 0 : i32
    return %arg1, %c0_i32 : i32, i32
  }
  func.func @transform_1(%arg0: i32, %arg1: i32) -> (i32, i32) {
    %c0_i32 = arith.constant 0 : i32
    %c0_i32_0 = arith.constant 0 : i32
    return %arg1, %c0_i32 : i32, i32
  }
  func.func @transform_2(%arg0: i32, %arg1: i32) -> (i32, i32) {
    %c0_i32 = arith.constant 0 : i32
    %c0_i32_0 = arith.constant 0 : i32
    return %arg1, %c0_i32 : i32, i32
  }
  func.func @transform_3(%arg0: i32, %arg1: i32) -> (i32, i32) {
    %c0_i32 = arith.constant 0 : i32
    %c0_i32_0 = arith.constant 0 : i32
    return %arg1, %c0_i32 : i32, i32
  }
  func.func @transform_4(%arg0: i32, %arg1: i32) -> (i32, i32) {
    %c0_i32 = arith.constant 0 : i32
    %c0_i32_0 = arith.constant 0 : i32
    return %c0_i32, %arg0 : i32, i32
  }
  func.func @transform_5(%arg0: i32, %arg1: i32) -> (i32, i32) {
    %c0_i32 = arith.constant 0 : i32
    %c0_i32_0 = arith.constant 0 : i32
    return %c0_i32, %arg0 : i32, i32
  }
  func.func @transform_6(%arg0: i32, %arg1: i32) -> (i32, i32) {
    %c0_i32 = arith.constant 0 : i32
    %c0_i32_0 = arith.constant 0 : i32
    return %c0_i32, %arg0 : i32, i32
  }
  func.func @transform_7(%arg0: i32, %arg1: i32) -> (i32, i32) {
    %c0_i32 = arith.constant 0 : i32
    %c0_i32_0 = arith.constant 0 : i32
    return %c0_i32, %arg0 : i32, i32
  }
  func.func @transform_8(%arg0: i32, %arg1: i32) -> (i32, i32) {
    %c0_i32 = arith.constant 0 : i32
    %c0_i32_0 = arith.constant 0 : i32
    return %c0_i32, %arg0 : i32, i32
  }
}

module attributes {stable_mosaic.version = 11 : i64} {
  func.func @_rel_cls_kernel(%arg0: i32, %arg1: memref<32x16xf32, #tpu.memory_space<vmem>>, %arg2: memref<32x1xi32, #tpu.memory_space<vmem>>, %arg3: memref<32x1xf32, #tpu.memory_space<vmem>>) attributes {dimension_semantics = [#tpu.dimension_semantics<parallel>], iteration_bounds = array<i64: 1>, scalar_prefetch = 0 : i64, scratch_operands = 0 : i64, tpu.core_type = #tpu.core_type<tc>, window_params = [{transform_indices = @transform_0, window_bounds = array<i64: 32, 16>}, {transform_indices = @transform_1, window_bounds = array<i64: 32, 1>}, {transform_indices = @transform_2, window_bounds = array<i64: 32, 1>}]} {
    %c0 = arith.constant 0 : index
    %c0_0 = arith.constant 0 : index
    %0 = vector.load %arg1[%c0, %c0_0] : memref<32x16xf32, #tpu.memory_space<vmem>>, vector<32x16xf32>
    %1 = tpu.iota {dimensions = array<i32: 1>} : vector<32x16xi32>
    %c0_i32 = arith.constant 0 : i32
    %2 = vector.broadcast %c0_i32 : i32 to vector<32x16xi32>
    %3 = arith.cmpi eq, %1, %2 : vector<32x16xi32>
    %cst = arith.constant 0.000000e+00 : f32
    %4 = vector.broadcast %cst : f32 to vector<32x16xf32>
    %5 = arith.select %3, %4, %0 : vector<32x16xi1>, vector<32x16xf32>
    %cst_1 = arith.constant dense<0xFF800000> : vector<32xf32>
    %6 = vector.multi_reduction <maximumf>, %5, %cst_1 [1] : vector<32x16xf32> to vector<32xf32>
    %7 = vector.shape_cast %6 : vector<32xf32> to vector<32x1xf32>
    %8 = vector.broadcast %7 : vector<32x1xf32> to vector<32x16xf32>
    %9 = arith.cmpf oeq, %5, %8 : vector<32x16xf32>
    %c16_i32 = arith.constant 16 : i32
    %10 = vector.broadcast %c16_i32 : i32 to vector<32x16xi32>
    %11 = arith.select %9, %1, %10 : vector<32x16xi1>, vector<32x16xi32>
    %cst_2 = arith.constant dense<2147483647> : vector<32xi32>
    %12 = vector.multi_reduction <minsi>, %11, %cst_2 [1] : vector<32x16xi32> to vector<32xi32>
    %13 = vector.shape_cast %12 : vector<32xi32> to vector<32x1xi32>
    %c0_3 = arith.constant 0 : index
    %c0_4 = arith.constant 0 : index
    %14 = vector.load %arg2[%c0_3, %c0_4] : memref<32x1xi32, #tpu.memory_space<vmem>>, vector<32x1xi32>
    tpu.vector_store %arg2[%c0_3, %c0_4], %13 {strides = array<i32>} : memref<32x1xi32, #tpu.memory_space<vmem>>, vector<32x1xi32>,
    %c0_5 = arith.constant 0 : index
    %c0_6 = arith.constant 0 : index
    %15 = vector.load %arg3[%c0_5, %c0_6] : memref<32x1xf32, #tpu.memory_space<vmem>>, vector<32x1xf32>
    tpu.vector_store %arg3[%c0_5, %c0_6], %7 {strides = array<i32>} : memref<32x1xf32, #tpu.memory_space<vmem>>, vector<32x1xf32>,
    return
  }
  func.func @transform_0(%arg0: i32) -> (i32, i32) {
    %c0_i32 = arith.constant 0 : i32
    %c0_i32_0 = arith.constant 0 : i32
    return %arg0, %c0_i32 : i32, i32
  }
  func.func @transform_1(%arg0: i32) -> (i32, i32) {
    %c0_i32 = arith.constant 0 : i32
    %c0_i32_0 = arith.constant 0 : i32
    return %arg0, %c0_i32 : i32, i32
  }
  func.func @transform_2(%arg0: i32) -> (i32, i32) {
    %c0_i32 = arith.constant 0 : i32
    %c0_i32_0 = arith.constant 0 : i32
    return %arg0, %c0_i32 : i32, i32
  }
}

</mosaic_0001>

<bundles_post_ra>
// kernel: _relation_match_padded.2
= control target key start
LH: loop header
LB: loop body
LE: loop exit
PB: predicated region body
PF: predicated region fallthrough
CT: control target
= control target key end

     0   :  { %v14_v0 = vlaneseq  ;;  %vm21_vm0 = vcmask 130048   ;;  %vm102_vm2 = vcmask 7168   ;;  %s186_s0 = inlined_call_operand.vmem [shape: f32[32,16], index: 0, kind: input, shape index: {}]   ;;  %s187_s2 = inlined_call_operand.vmem [shape: f32[32,1], index: 2, kind: output, shape index: {1}]   ;;  %s188_s1 = inlined_call_operand.vmem [shape: s32[32,1], index: 1, kind: output, shape index: {0}]  }
   0x1   :  { %v10_v1 = vld [vmem:[%s186_s0] sm:$0xff]  ;;  %v12_v3 = vld [vmem:[%s186_s0 + $0x10] sm:$0xff]  ;;  %v11_v4 = vld [vmem:[%s186_s0 + $0x8] sm:$0xff] }
   0x2   :  { %v15_v2 = vand.u32 127, %v14_v0  ;;  %v13_v5 = vld [vmem:[%s186_s0 + $0x18] sm:$0xff] }
   0x4   :  { %vm16_vm1 = vcmp.eq.s32.totalorder %v15_v2, 0 }
   0x5   :  { %v17_v6 = vsel %vm16_vm1, 0.0, %v10_v1  ;;  %v19_v7 = vsel %vm16_vm1, 0.0, %v12_v3  ;;  %v18_v8 = vsel %vm16_vm1, 0.0, %v11_v4  ;;  %v20_v9 = vsel %vm16_vm1, 0.0, %v13_v5 }
   0x6   :  { %v22_v10 = vsel %vm21_vm0, %v17_v6, -inf  ;;  %v28_v11 = vsel %vm21_vm0, %v19_v7, -inf  ;;  %v25_v12 = vsel %vm21_vm0, %v18_v8, -inf  ;;  %v31_v13 = vsel %vm21_vm0, %v20_v9, -inf }
   0x7   :  { %23 = vmax.xlane.f32.xlu0 %v22_v10  ;;  %29 = vmax.xlane.f32.xlu1 %v28_v11 }
   0xb   :  { %26 = vmax.xlane.f32.xlu0 %v25_v12  ;;  %32 = vmax.xlane.f32.xlu1 %v31_v13 }
  0x94   :  { %v24_v14 = vpop.xlane.xlu0 %23  ;;  %v30_v15 = vpop.xlane.xlu1 %29 }
  0x95   :  { %vm34_vm3 = vcmp.eq.f32.partialorder %v17_v6, %v24_v14  ;;  %107 = vst.msk [vmem:[%s187_s2] sm:$0xff] %vm102_vm2, %v24_v14  ;;  %vm36_vm4 = vcmp.eq.f32.partialorder %v19_v7, %v30_v15  ;;  %109 = vst.msk [vmem:[%s187_s2 + $0x10] sm:$0xff] %vm102_vm2, %v30_v15 }
  0x96   :  { %v38_v16 = vsel %vm34_vm3, %v15_v2, 16  ;;  %v40_v17 = vsel %vm36_vm4, %v15_v2, 16 }
  0x97   :  { %v42_v18 = vsel %vm21_vm0, %v38_v16, 2147483647  ;;  %v72_v19 = vsel %vm21_vm0, %v40_v17, 2147483647 }
  0x98   :  { %v27_v20 = vpop.xlane.xlu0 %26  ;;  %v33_v21 = vpop.xlane.xlu1 %32  ;;  %v44_v22 = vshra.s32 %v42_v18, 16  ;;  %v74_v23 = vshra.s32 %v72_v19, 16  ;;  %v43_v34 = vand.u32 65535, %v42_v18  ;;  %v73_v38 = vand.u32 65535, %v72_v19 }
  0x99   :  { %vm35_vm5 = vcmp.eq.f32.partialorder %v18_v8, %v27_v20  ;;  %108 = vst.msk [vmem:[%s187_s2 + $0x8] sm:$0xff] %vm102_vm2, %v27_v20  ;;  %vm37_vm6 = vcmp.eq.f32.partialorder %v20_v9, %v33_v21  ;;  %110 = vst.msk [vmem:[%s187_s2 + $0x18] sm:$0xff] %vm102_vm2, %v33_v21 }
  0x9a   :  { %v39_v24 = vsel %vm35_vm5, %v15_v2, 16  ;;  %v41_v25 = vsel %vm37_vm6, %v15_v2, 16  ;;  %v46_v26 = vcvt.s32.f32 %v44_v22  ;;  %v76_v29 = vcvt.s32.f32 %v74_v23 }
  0x9b   :  { %v57_v27 = vsel %vm21_vm0, %v39_v24, 2147483647  ;;  %v87_v28 = vsel %vm21_vm0, %v41_v25, 2147483647  ;;  %v45_v36 = vcvt.s32.f32 %v43_v34  ;;  %v75_v43 = vcvt.s32.f32 %v73_v38 }
  0x9c   :  { %47 = vmin.xlane.f32.xlu0 %v46_v26  ;;  %v59_v30 = vshra.s32 %v57_v27, 16  ;;  %v89_v31 = vshra.s32 %v87_v28, 16  ;;  %v58_v37 = vand.u32 65535, %v57_v27  ;;  %v88_v44 = vand.u32 65535, %v87_v28 }
  0x9e   :  { %v61_v32 = vcvt.s32.f32 %v59_v30  ;;  %v91_v33 = vcvt.s32.f32 %v89_v31  ;;  %v60_v42 = vcvt.s32.f32 %v58_v37  ;;  %v90_v48 = vcvt.s32.f32 %v88_v44 }
  0xa0   :  { %77 = vmin.xlane.f32.xlu0 %v76_v29  ;;  %62 = vmin.xlane.f32.xlu1 %v61_v32 }
  0xa4   :  { %92 = vmin.xlane.f32.xlu1 %v91_v33 }
 0x129   :  { %v48_v35 = vpop.xlane.xlu0 %47 }
 0x12a   :  { %vm49_vm7 = vcmp.eq.f32.partialorder %v46_v26, %v48_v35  ;;  %v54_v50 = vcvt.f32.s32 %v48_v35 }
 0x12b   :  { %v50_v39 = vsel %vm49_vm7, %v45_v36, inf }
 0x12c   :  { %51 = vmin.xlane.f32.xlu0 %v50_v39  ;;  %v55_v53 = vshll.u32 %v54_v50, 16 }
 0x12d   :  { %v63_v40 = vpop.xlane.xlu1 %62  ;;  %v78_v41 = vpop.xlane.xlu0 %77 }
 0x12e   :  { %vm64_vm8 = vcmp.eq.f32.partialorder %v61_v32, %v63_v40  ;;  %vm79_vm9 = vcmp.eq.f32.partialorder %v76_v29, %v78_v41  ;;  %v69_v51 = vcvt.f32.s32 %v63_v40  ;;  %v84_v54 = vcvt.f32.s32 %v78_v41 }
 0x12f   :  { %v65_v45 = vsel %vm64_vm8, %v60_v42, inf  ;;  %v80_v46 = vsel %vm79_vm9, %v75_v43, inf }
 0x130   :  { %66 = vmin.xlane.f32.xlu1 %v65_v45  ;;  %81 = vmin.xlane.f32.xlu0 %v80_v46  ;;  %v70_v57 = vshll.u32 %v69_v51, 16  ;;  %v85_v60 = vshll.u32 %v84_v54, 16 }
 0x131   :  { %v93_v47 = vpop.xlane.xlu1 %92 }
 0x132   :  { %vm94_vm10 = vcmp.eq.f32.partialorder %v91_v33, %v93_v47  ;;  %v99_v61 = vcvt.f32.s32 %v93_v47 }
 0x133   :  { %v95_v49 = vsel %vm94_vm10, %v90_v48, inf }
 0x134   :  { %96 = vmin.xlane.f32.xlu1 %v95_v49  ;;  %v100_v3 = vshll.u32 %v99_v61, 16 }
 0x1b9   :  { %v52_v52 = vpop.xlane.xlu0 %51 }
 0x1ba   :  { %v53_v55 = vcvt.f32.s32 %v52_v52 }
 0x1bc   :  { %v56_v56 = vadd.s32 %v55_v53, %v53_v55 }
 0x1bd   :  { %v67_v58 = vpop.xlane.xlu1 %66  ;;  %v82_v59 = vpop.xlane.xlu0 %81 }
 0x1be   :  { %103 = vst.msk [vmem:[%s188_s1] sm:$0xff] %vm102_vm2, %v56_v56  ;;  %v68_v62 = vcvt.f32.s32 %v67_v58  ;;  %v83_v63 = vcvt.f32.s32 %v82_v59 }
 0x1c0   :  { %v71_v0 = vadd.s32 %v70_v57, %v68_v62  ;;  %v86_v1 = vadd.s32 %v85_v60, %v83_v63 }
 0x1c1   :  { %v97_v2 = vpop.xlane.xlu1 %96 }
 0x1c2   :  { %104 = vst.msk [vmem:[%s188_s1 + $0x8] sm:$0xff] %vm102_vm2, %v71_v0  ;;  %105 = vst.msk [vmem:[%s188_s1 + $0x10] sm:$0xff] %vm102_vm2, %v86_v1  ;;  %v98_v4 = vcvt.f32.s32 %v97_v2 }
 0x1c4   :  { %v101_v5 = vadd.s32 %v100_v3, %v98_v4 }
 0x1c6   :  { %106 = vst.msk [vmem:[%s188_s1 + $0x18] sm:$0xff] %vm102_vm2, %v101_v5 }

// kernel: _relation_match_padded.3
= control target key start
LH: loop header
LB: loop body
LE: loop exit
PB: predicated region body
PF: predicated region fallthrough
CT: control target
= control target key end

     0   :  { %v227_v2 = vmov 0   ;;  %s379_s0 = inlined_call_operand.vmem [shape: s32[32,1], index: 0, kind: input, shape index: {}]   ;;  %s380_s1 = inlined_call_operand.vmem [shape: s32[32,1], index: 1, kind: input, shape index: {}]   ;;  %s381_s2 = inlined_call_operand.vmem [shape: s32[32,1], index: 2, kind: input, shape index: {}]   ;;  %s382_s3 = inlined_call_operand.vmem [shape: f32[32,1], index: 3, kind: input, shape index: {}]   ;;  %s383_s4 = inlined_call_operand.vmem [shape: s32[1,128], index: 4, kind: input, shape index: {}]   ;;  %s384_s5 = inlined_call_operand.vmem [shape: s32[1,128], index: 5, kind: input, shape index: {}]   ;;  %s385_s6 = inlined_call_operand.vmem [shape: f32[1,128], index: 6, kind: input, shape index: {}]   ;;  %s386_s7 = inlined_call_operand.vmem [shape: f32[1,128], index: 7, kind: input, shape index: {}]   ;;  %s387_s8 = inlined_call_operand.hbm [shape: f32[8,128], index: 8, kind: output, shape index: {}]  }
   0x1   :  { %v60_v0 = vld [vmem:[%s380_s1] sm:$0xff]  ;;  %202 = vset.pattern.permute.xlu1 %v227_v2  ;;  %201 = vset.pattern.permute.xlu0 %v227_v2  ;;  %v61_v3 = vld [vmem:[%s380_s1 + $0x8] sm:$0xff] }
   0x2   :  { %v35_v1 = vld [vmem:[%s379_s0] sm:$0xff]  ;;  %66 = vperm.xlu1 %202, %v60_v0   ;;  %v36_v4 = vld [vmem:[%s379_s0 + $0x8] sm:$0xff] }
   0x3   :  { %41 = vperm.xlu0 %201, %v35_v1  }
   0x6   :  { %69 = vperm.xlu1 %202, %v61_v3  }
   0x7   :  { %44 = vperm.xlu0 %201, %v36_v4  }
   0x8   :  { %13 = vsyncpa [#allocation3], 0  ;;  %v62_v5 = vld [vmem:[%s380_s1 + $0x10] sm:$0xff]  ;;  %v98_v7 = vld [vmem:[%s382_s3 + $0x8] sm:$0xff]  ;;  %v228_v21 = vmov 0.0   ;;  %s229_s17 = smov [#allocation2]  }
   0x9   :  { %v37_v6 = vld [vmem:[%s379_s0 + $0x10] sm:$0xff]  ;;  %v97_v8 = vld [vmem:[%s382_s3] sm:$0xff]  ;;  %v63_v9 = vld [vmem:[%s380_s1 + $0x18] sm:$0xff]  ;;  %34 = vst [vmem:[#allocation2] sm:$0xff] %v228_v21  ;;  %s188_s18 = sshll.u32 %s229_s17, 4  ;;  %s189_s18 = int_to_ptr.vmem [resolvable:$true] %s188_s18 }
   0xa   :  { %72 = vperm.xlu1 %202, %v62_v5   ;;  %v38_v10 = vld [vmem:[%s379_s0 + $0x18] sm:$0xff]  ;;  %v99_v12 = vld [vmem:[%s382_s3 + $0x10] sm:$0xff]  ;;  %v90_v13 = vld [vmem:[%s381_s2 + $0x8] sm:$0xff]  ;;  %s203_s19 = scalar_lea.vmem %s189_s18, 128  ;;  %p208_p1 = scmp.lt.s32.totalorder %s189_s18, %s189_s18 }
   0xb   :  { %47 = vperm.xlu0 %201, %v37_v6   ;;  %v100_v11 = vld [vmem:[%s382_s3 + $0x18] sm:$0xff]  ;;  %v89_v14 = vld [vmem:[%s381_s2] sm:$0xff]  ;;  %v94_v15 = vcvt.s32.f32 %v90_v13  ;;  %v91_v18 = vld [vmem:[%s381_s2 + $0x10] sm:$0xff]  ;;  %p204_p0 = scmp.ne.s32.totalorder %s189_s18, %s203_s19  ;;  %p209_p2 = scmp.lt.s32.totalorder %s203_s19, %s203_s19 }
   0xc   :  { %v93_v16 = vcvt.s32.f32 %v89_v14  ;;  %v92_v17 = vld [vmem:[%s381_s2 + $0x18] sm:$0xff]  ;;  %v95_v20 = vcvt.s32.f32 %v91_v18  ;;  %v197_v28 = vld [vmem:[%s384_s5] ss:$0 sm:$0xff] }
   0xd   :  { %v96_v19 = vcvt.s32.f32 %v92_v17  ;;  %v196_v29 = vld [vmem:[%s383_s4] ss:$0 sm:$0xff]  ;;  %p210_p3 = por %p209_p2, %p208_p1 }
   0xe   :  { %141 = vperm.xlu1 %202, %v98_v7  }
   0xf   :  { %136 = vperm.xlu0 %201, %v97_v8   ;;  %p211_p4 = pnand %p210_p3, %p204_p0 }
  0x10   :  { %v170_v0 = vld [vmem:[#allocation2 + $0x1] sm:$0x1]  ;;  %v167_v7 = vld [vmem:[#allocation2] sm:$0x1] }
  0x12   :  { %75 = vperm.xlu1 %202, %v63_v9   ;;  %v177_v9 = vld [vmem:[%s385_s6] sm:$0x1] }
  0x13   :  { %50 = vperm.xlu0 %201, %v38_v10  }
  0x16   :  { %151 = vperm.xlu1 %202, %v100_v11  }
  0x17   :  { %146 = vperm.xlu0 %201, %v99_v12   ;;  %v179_v12 = vld [vmem:[%s386_s7] sm:$0x1] }
  0x1a   :  { %108 = vperm.xlu1 %202, %v94_v15  }
  0x1b   :  { %103 = vperm.xlu0 %201, %v93_v16  }
  0x1e   :  { %118 = vperm.xlu1 %202, %v96_v19  }
  0x1f   :  { %113 = vperm.xlu0 %201, %v95_v20  }
  0x81   :  { %v67_v22 = vpop.permute.xlu1 %66 }
  0x82   :  { %v42_v23 = vpop.permute.xlu0 %41  ;;  %vm81_vm0 = vcmp.eq.s32.totalorder %v67_v22, %v197_v28 }
  0x83   :  { %vm56_vm1 = vcmp.eq.s32.totalorder %v42_v23, %v196_v29 }
  0x84   :  { %vm329_vm4 = vmand %vm56_vm1, %vm81_vm0 }
  0x85   :  { %v70_v24 = vpop.permute.xlu1 %69 }
  0x86   :  { %v45_v25 = vpop.permute.xlu0 %44  ;;  %vm82_vm2 = vcmp.eq.s32.totalorder %v70_v24, %v197_v28 }
  0x87   :  { %vm57_vm3 = vcmp.eq.s32.totalorder %v45_v25, %v196_v29 }
  0x88   :  { %vm333_vm5 = vmand %vm57_vm3, %vm82_vm2 }
  0x89   :  { %v73_v26 = vpop.permute.xlu1 %72 }
  0x8a   :  { %v48_v27 = vpop.permute.xlu0 %47  ;;  %vm83_vm6 = vcmp.eq.s32.totalorder %v73_v26, %v197_v28 }
  0x8b   :  { %vm58_vm7 = vcmp.eq.s32.totalorder %v48_v27, %v196_v29 }
  0x8c   :  { %vm341_vm10 = vmand %vm58_vm7, %vm83_vm6 }
  0x8d   :  { %v142_v30 = vpop.permute.xlu1 %141 }
  0x8e   :  { %v137_v31 = vpop.permute.xlu0 %136  ;;  %v155_v36 = vsel %vm333_vm5, %v142_v30, 0.0 }
  0x8f   :  { %v154_v37 = vsel %vm329_vm4, %v137_v31, 0.0 }
  0x90   :  { %v158_v38 = vadd.f32 %v155_v36, %v154_v37 }
  0x91   :  { %v76_v34 = vpop.permute.xlu1 %75 }
  0x92   :  { %v51_v35 = vpop.permute.xlu0 %50  ;;  %vm84_vm8 = vcmp.eq.s32.totalorder %v76_v34, %v197_v28 }
  0x93   :  { %vm59_vm9 = vcmp.eq.s32.totalorder %v51_v35, %v196_v29 }
  0x94   :  { %vm347_vm11 = vmand %vm59_vm9, %vm84_vm8 }
  0x95   :  { %v152_v39 = vpop.permute.xlu1 %151 }
  0x96   :  { %v147_v41 = vpop.permute.xlu0 %146  ;;  %v157_v45 = vsel %vm347_vm11, %v152_v39, 0.0 }
  0x97   :  { %v156_v42 = vsel %vm341_vm10, %v147_v41, 0.0 }
  0x98   :  { %v159_v44 = vadd.f32 %v158_v38, %v156_v42 }
  0x99   :  { %v109_v47 = vpop.permute.xlu1 %108 }
  0x9a   :  { %v160_v46 = vadd.f32 %v159_v44, %v157_v45  ;;  %v104_v48 = vpop.permute.xlu0 %103  ;;  %v122_v49 = vsel %vm333_vm5, %v109_v47, 0.0 }
  0x9b   :  { %v121_v50 = vsel %vm329_vm4, %v104_v48, 0.0 }
  0x9c   :  { %v161_v51 = vrot.slane %v160_v46, 4  ;;  %v125_v53 = vadd.f32 %v122_v49, %v121_v50 }
  0x9d   :  { %v119_v54 = vpop.permute.xlu1 %118 }
  0x9e   :  { %v162_v52 = vadd.f32 %v161_v51, %v160_v46  ;;  %v114_v55 = vpop.permute.xlu0 %113  ;;  %v124_v59 = vsel %vm347_vm11, %v119_v54, 0.0 }
  0x9f   :  { %v123_v56 = vsel %vm341_vm10, %v114_v55, 0.0 }
  0xa0   :  { %v163_v57 = vrot.slane %v162_v52, 2  ;;  %v126_v58 = vadd.f32 %v125_v53, %v123_v56 }
  0xa2   :  { %v164_v60 = vadd.f32 %v163_v57, %v162_v52  ;;  %v127_v61 = vadd.f32 %v126_v58, %v124_v59 }
  0xa4   :  { %v165_v62 = vrot.slane %v164_v60, 1  ;;  %v128_v63 = vrot.slane %v127_v61, 4 }
  0xa6   :  { %v166_v1 = vadd.f32 %v165_v62, %v164_v60  ;;  %v129_v2 = vadd.f32 %v128_v63, %v127_v61 }
  0xa8   :  { %v130_v3 = vrot.slane %v129_v2, 2  ;;  %v171_v4 = vadd.f32 %v170_v0, %v166_v1 }
  0xaa   :  { %v131_v5 = vadd.f32 %v130_v3, %v129_v2  ;;  %172 = vst [vmem:[#allocation2 + $0x1] sm:$0x1] %v171_v4 }
  0xac   :  { %v132_v6 = vrot.slane %v131_v5, 1 }
  0xae   :  { %v133_v8 = vadd.f32 %v132_v6, %v131_v5 }
  0xb0   :  { %v168_v10 = vadd.f32 %v167_v7, %v133_v8 }
  0xb1   :  { %v176_v11 = vld [vmem:[#allocation2 + $0x1] sm:$0x1] }
  0xb2   :  { %169 = vst [vmem:[#allocation2] sm:$0x1] %v168_v10  ;;  %v178_v13 = vmul.f32 %v177_v9, %v176_v11 }
  0xb4   :  { %v180_v14 = vmul.f32 %v179_v12, %v178_v13 }
  0xb6   :  { %181 = vst [vmem:[#allocation2 + $0x2] sm:$0x1] %v180_v14 }
  0xb7   :  { %214 = shalt.err (!%p211_p4)
}
  0xb8   :  { %s215_s21 = scalar_lea.hbm %s387_s8, 128 }
  0xb9   :  { %p216_p5 = scmp.ne.s32.totalorder %s387_s8, %s215_s21  ;;  %p219_p6 = scmp.lt.u32.totalorder %s215_s21, %s387_s8 }
  0xbb   :  { %p221_p7 = pnand %p219_p6, %p216_p5 }
  0xbd   :  { %224 = shalt.err (!%p221_p7)
}
  0xbe   :  { %191 = dma.vmem_to_hbm [thread:$0]  %s189_s18, 128, %s387_s8, [#allocation3]  }
  0xbf   :  { %225 = dma.done.wait [#allocation3], 128  }
  0xc0   :  { %226 = vsyncadd [#allocation3], 4294967168 }
  0xc1   :  { %195 = vsyncpa [#allocation3], 1 }

</bundles_post_ra>
